<compile_context>
chip_gen: v7x
topology: tpu7x:2x2x1
jax: 0.10.0
libtpu: 0.0.40
codegen_flags: <defaults>
</compile_context>

<pallas_src>
import functools

import jax
import jax.numpy as jnp
from jax.experimental import pallas as pl
from jax.experimental.pallas import tpu as pltpu


def _round_up(n, m):
    return ((n + m - 1) // m) * m


def _seq_maxpool_kernel(x_ref, o_ref, *, reduction):
    # x_ref: (1, TQ*reduction, TE) VMEM tile;  o_ref: (1, TQ, TE)
    tq = o_ref.shape[1]
    te = o_ref.shape[2]
    x = x_ref[0, :, :]                       # (TQ*reduction, TE)
    x = x.reshape(tq, reduction, te)         # consecutive rows = one pool window
    o_ref[0, :, :] = jnp.max(x, axis=1)


def sequence_pooling_1d(x, reduction=1, *, target_in_bytes=1 << 20):
    """x: (batch, sequence, embedding) -> (batch, sequence // reduction, embedding)."""
    b, s, e = x.shape
    if reduction <= 1:
        # nn.Identity() branch of the module.
        return x

    seq_out = s // reduction                 # MaxPool1d floor mode
    if seq_out == 0:
        # reduction > sequence: empty output, nothing to launch.
        return x[:, :0, :]

    itemsize = jnp.dtype(x.dtype).itemsize

    # --- Embedding tile: full E unless even a minimum-height (8-row) input
    #     tile would exceed the per-step byte budget; then split in 128-lane
    #     multiples so stores stay lane-dense.
    te = e
    if e % 128 == 0 and 8 * reduction * e * itemsize > target_in_bytes:
        te = max(128, (target_in_bytes // (8 * reduction * 128 * itemsize)) * 128)
        te = min(te, e)
    n_emb_tiles = pl.cdiv(e, te)

    # --- Sequence tile: as many output rows as fit the budget, sublane-aligned.
    tq = target_in_bytes // max(1, reduction * te * itemsize)
    tq = max(8, (tq // 8) * 8)
    tq = min(tq, _round_up(seq_out, 8))      # don't exceed the problem
    n_seq_tiles = pl.cdiv(seq_out, tq)

    kernel = functools.partial(_seq_maxpool_kernel, reduction=reduction)

    bytes_accessed = b * e * itemsize * (seq_out * reduction + seq_out)
    flops = b * seq_out * (reduction - 1) * e   # one compare per extra row

    return pl.pallas_call(
        kernel,
        out_shape=jax.ShapeDtypeStruct((b, seq_out, e), x.dtype),
        grid_spec=pltpu.PrefetchScalarGridSpec(
            num_scalar_prefetch=0,
            grid=(b, n_seq_tiles, n_emb_tiles),
            in_specs=[
                pl.BlockSpec((1, tq * reduction, te), lambda i, j, k: (i, j, k)),
            ],
            out_specs=pl.BlockSpec((1, tq, te), lambda i, j, k: (i, j, k)),
        ),
        compiler_params=pltpu.CompilerParams(
            dimension_semantics=("parallel", "parallel", "parallel"),
        ),
        cost_estimate=pl.CostEstimate(
            flops=flops, transcendentals=0, bytes_accessed=bytes_accessed,
        ),
    )(x)


def _reference(x, reduction):
    # Pure-JAX reference of the PyTorch module's semantics.
    if reduction <= 1:
        return x
    b, s, e = x.shape
    so = s // reduction
    if so == 0:
        return x[:, :0, :]
    return jnp.max(x[:, : so * reduction, :].reshape(b, so, reduction, e), axis=2)


if __name__ == "__main__":
    key = jax.random.PRNGKey(0)
    k1, k2, k3, k4 = jax.random.split(key, 4)

    # Case 1: evenly divisible sequence (batch=2, seq=16, emb=128, reduction=2).
    x1 = jax.random.normal(k1, (2, 16, 128), dtype=jnp.float32)
    out1 = jax.block_until_ready(sequence_pooling_1d(x1, reduction=2))
    assert out1.shape == (2, 8, 128)
    assert jnp.allclose(out1, _reference(x1, 2)), "mismatch (even case)"

    # Case 2: trailing remainder (floor mode), handled without any wrapper-side
    # trim copy of x.
    x2 = jax.random.normal(k2, (2, 19, 128), dtype=jnp.float32)
    out2 = jax.block_until_ready(sequence_pooling_1d(x2, reduction=4))
    assert out2.shape == (2, 4, 128)
    assert jnp.allclose(out2, _reference(x2, 4)), "mismatch (remainder case)"

    # Case 3: reduction=1 -> Identity branch of the module.
    out3 = sequence_pooling_1d(x1, reduction=1)
    assert out3.shape == x1.shape and jnp.allclose(out3, x1)

    # Case 4: bf16 (packed sublanes) with reduction=3.
    x4 = jax.random.normal(k3, (2, 24, 128), dtype=jnp.bfloat16)
    out4 = jax.block_until_ready(sequence_pooling_1d(x4, reduction=3))
    assert out4.shape == (2, 8, 128)
    assert jnp.array_equal(out4, _reference(x4, 3)), "mismatch (bf16 case)"

    # Case 5: exercise the embedding-tiling path (tiny budget forces TE=128
    # splits of emb=256) — same semantics, multi-tile grid on the lane axis.
    x5 = jax.random.normal(k4, (2, 16, 256), dtype=jnp.float32)
    out5 = jax.block_until_ready(
        sequence_pooling_1d(x5, reduction=2, target_in_bytes=8 * 2 * 128 * 4)
    )
    assert out5.shape == (2, 8, 256)
    assert jnp.allclose(out5, _reference(x5, 2)), "mismatch (emb-tiled case)"

    print("KERNEL_OK")
</pallas_src>

<mosaic_0001>
module attributes {stable_mosaic.version = 11 : i64} {
  func.func @_seq_maxpool_kernel(%arg0: i32, %arg1: i32, %arg2: i32, %arg3: memref<1x16x128xf32, #tpu.memory_space<vmem>>, %arg4: memref<1x8x128xf32, #tpu.memory_space<vmem>>) attributes {dimension_semantics = [#tpu.dimension_semantics<parallel>, #tpu.dimension_semantics<parallel>, #tpu.dimension_semantics<parallel>], iteration_bounds = array<i64: 2, 1, 1>, scalar_prefetch = 0 : i64, scratch_operands = 0 : i64, tpu.core_type = #tpu.core_type<tc>, window_params = [{transform_indices = @transform_0, window_bounds = array<i64: 1, 16, 128>}, {transform_indices = @transform_1, window_bounds = array<i64: 1, 8, 128>}]} {
    %c0 = arith.constant 0 : index
    %c0_0 = arith.constant 0 : index
    %c0_1 = arith.constant 0 : index
    %0 = vector.load %arg3[%c0, %c0_0, %c0_1] : memref<1x16x128xf32, #tpu.memory_space<vmem>>, vector<1x16x128xf32>
    %1 = vector.shape_cast %0 : vector<1x16x128xf32> to vector<16x128xf32>
    %2 = vector.shape_cast %1 : vector<16x128xf32> to vector<8x2x128xf32>
    %cst = arith.constant dense<0xFF800000> : vector<8x128xf32>
    %3 = vector.multi_reduction <maximumf>, %2, %cst [1] : vector<8x2x128xf32> to vector<8x128xf32>
    %c0_2 = arith.constant 0 : index
    %c0_3 = arith.constant 0 : index
    %c0_4 = arith.constant 0 : index
    %4 = vector.load %arg4[%c0_2, %c0_3, %c0_4] : memref<1x8x128xf32, #tpu.memory_space<vmem>>, vector<1x8x128xf32>
    %5 = vector.shape_cast %4 : vector<1x8x128xf32> to vector<8x128xf32>
    %6 = vector.shape_cast %3 : vector<8x128xf32> to vector<1x8x128xf32>
    tpu.vector_store %arg4[%c0_2, %c0_3, %c0_4], %6 {strides = array<i32>} : memref<1x8x128xf32, #tpu.memory_space<vmem>>, vector<1x8x128xf32>,
    return
  }
  func.func @transform_0(%arg0: i32, %arg1: i32, %arg2: i32) -> (i32, i32, i32) {
    %c0_i32 = arith.constant 0 : i32
    return %arg0, %arg1, %arg2 : i32, i32, i32
  }
  func.func @transform_1(%arg0: i32, %arg1: i32, %arg2: i32) -> (i32, i32, i32) {
    %c0_i32 = arith.constant 0 : i32
    return %arg0, %arg1, %arg2 : i32, i32, i32
  }
}

</mosaic_0001>

<bundles_post_ra>
// kernel: tpu_custom_call.1
= control target key start
LH: loop header
LB: loop body
LE: loop exit
PB: predicated region body
PF: predicated region fallthrough
CT: control target
= control target key end

     0   :  { %6 = vsyncpa [#allocation3], 0  ;;  %s791_s0 = inlined_call_operand.hbm [shape: f32[2,16,128], index: 0, kind: input, shape index: {}]   ;;  %s792_s1 = inlined_call_operand.hbm [shape: f32[2,8,128], index: 1, kind: output, shape index: {}]  }
   0x1   :  { %8 = vsyncpa [#allocation3 + $0x1], 0 }
   0x2   :  { %9 = vsyncpa [#allocation4], 0 }
   0x3   :  { %11 = vsyncpa [#allocation4 + $0x1], 0  ;;  %s607_s6 = smov 0   ;;  %s609_s7 = smov 0  }
   0x4   :  { %s611_s8 = smov 0   ;;  %s613_s9 = smov 0  }
   0x5   :  { %s615_s10 = smov 0   ;;  %s617_s11 = smov 0  }
   0x6 LB: > { %s396_s12 = sadd.s32 4294967295, %s590_s11   ;;  %s397_s13 = sadd.s32 4294967294, %s590_s11   ;;  %s590_s11 = sphi %s617_s11, %s17_s11   ;;  %s586_s10 = sphi %s615_s10, %s807_s10   ;;  %s582_s9 = sphi %s613_s9, %s806_s9   ;;  %s578_s8 = sphi %s611_s8, %s805_s8   ;;  %s574_s7 = sphi %s609_s7, %s804_s7   ;;  %s570_s6 = sphi %s607_s6, %s803_s6  }
   0x7   : > { %s36_s14 = sadd.s32 1, %s586_s10  ;;  %s47_s15 = sadd.s32 1, %s578_s8 }
   0x8   : > { %p38_p0 = scmp.ge.s32.totalorder %s36_s14, 2  ;;  %p54_p1 = scmp.ne.s32.totalorder %s578_s8, %s574_s7 }
   0x9   : > { %p55_p2 = scmp.eq.s32.totalorder %s590_s11, 0  ;;  %p60_p3 = scmp.ne.s32.totalorder %s574_s7, %s570_s6 }
   0xa   : > { %s809_s14 = smov (%p38_p0, %s36_s14), 0  ;;  %p61_p5 = scmp.eq.s32.totalorder %s396_s12, 0 }
   0xb   : > { %p648_p4 = por %p55_p2, %p54_p1  ;;  %s40_s17 = ssub.s32 %s586_s10, %s809_s14 }
   0xc   : > { %p88_p6 = scmp.eq.s32.totalorder %s396_s12, 1  ;;  %p45_p7 = scmp.eq.s32.totalorder %s40_s17, 0 }
   0xd   : > { %p654_p8 = por %p61_p5, %p60_p3  ;;  %p94_p10 = scmp.eq.s32.totalorder %s397_s13, 1 }
   0xe   : > { %p658_p9 = por %p88_p6, %p54_p1  ;;  %p423_p13 = scmp.lt.s32.totalorder %s590_s11, 2 }
   0xf   : > { %s663_s20 = scalar_select %p45_p7, %s578_s8, %s47_s15  }
  0x10   : > { %s796_s19 = scalar_select %p658_p9, 1, 0 }
  0x11   : > { %p665_p11 = por %p94_p10, %p60_p3  ;;  %s114_s22 = sand.u32 1, %s578_s8  }
  0x12   : > { %s400_s23 = sshll.u32 %s114_s22, 4  ;;  %s410_s24 = sshll.u32 %s586_s10, 8 }
  0x13   : > { %s797_s21 = scalar_select %p665_p11, 1, 0 }
  0x14   : > { %s676_s27 = scalar_lea.hbm %s791_s0, %s410_s24  ;;  %s118_s28 = scalar_lea.vmem [#allocation2], %s400_s23 }
  0x15   : > { %s128_s29 = sshll.u32 %s118_s28, 4  ;;  %p682_p0 = pnand %p423_p13, %p648_p4  ;;  %s678_s29 = int_to_ptr.vmem [resolvable:$true] %s128_s29 }
  0x16   : > { %s687_s2 = scalar_lea.sflag [#allocation3], %s114_s22  ;;  %s478_s3 = scalar_lea.hbm %s676_s27, 256 }
  0x17   : > { %p479_p2 = scmp.ne.s32.totalorder %s676_s27, %s478_s3  ;;  %p480_p3 = pneg %p682_p0 }
  0x18   : > { %s483_s12 = scalar_lea.hbm %s791_s0, 512  ;;  %p484_p4 = scmp.lt.u32.totalorder %s676_s27, %s791_s0 }
  0x19   : > { %p481_p5 = pnand %p480_p3, %p479_p2  ;;  %p485_p7 = scmp.lt.u32.totalorder %s483_s12, %s478_s3 }
  0x1a   : > { %p487_p13 = scmp.lt.u32.totalorder %s478_s3, %s676_s27 }
  0x1b   : > { %p482_p6 = pneg %p481_p5  ;;  %p486_p10 = por %p485_p7, %p484_p4 }
  0x1d   : > { %p488_p12 = por %p487_p13, %p486_p10 }
  0x1f   : > { %p489_p1 = pnand %p488_p12, %p482_p6 }
  0x21   : > { %492 = shalt.err (!%p489_p1)
}
  0x22   : > { %s493_s16 = scalar_lea.vmem %s678_s29, 256  ;;  %s592_s17 = smov [#allocation2]  }
  0x23   : > { %p494_p2 = scmp.ne.s32.totalorder %s678_s29, %s493_s16  ;;  %s498_s22 = sshll.u32 %s592_s17, 4  ;;  %s499_s22 = int_to_ptr.vmem [resolvable:$false] %s498_s22 }
  0x24   : > { %s500_s23 = scalar_lea.vmem %s499_s22, 512  ;;  %p501_p9 = scmp.lt.s32.totalorder %s678_s29, %s499_s22 }
  0x25   : > { %p496_p5 = pnand %p494_p2, %p480_p3  ;;  %p502_p4 = scmp.lt.s32.totalorder %s500_s23, %s493_s16 }
  0x27   : > { %p497_p11 = pneg %p496_p5  ;;  %p503_p7 = por %p502_p4, %p501_p9 }
  0x29   : > { %p504_p10 = pnand %p503_p7, %p497_p11 }
  0x2b   : > { %507 = shalt.err (!%p504_p10)
}
  0x2c   : > { %s593_s24 = smov 128   ;;  %s594_s25 = smov 8  }
  0x2d   : > { %418 = dma.hbm_to_vmem [thread:$0]  (!%p682_p0), %s676_s27, 256, %s678_s29, %s687_s2, %s593_s24, %s593_s24, %s594_s25  }
  0x2e   : > { %p136_p12 = scmp.lt.s32.totalorder %s590_s11, 3  ;;  %p799_p1 = scmp.ge.s32.totalorder %s590_s11, 1 }
  0x30   : > { %p137_p3 = pnand %p799_p1, %p136_p12 }
  0x31   : > { %s719_s26 = sand.u32 (!%p137_p3), 1, %s574_s7  }
  0x32   : > { %140 = sbr.rel (%p137_p3) target bundleno = 103 (0x67), region = 24  ;;  %s404_s28 = sshll.u32 (!%p137_p3), %s719_s26, 4 }
  0x33   : > { %s143_s3 = scalar_lea.sflag (!%p137_p3), [#allocation3], %s719_s26  ;;  %s146_s4 = scalar_lea.vmem (!%p137_p3), [#allocation2], %s404_s28 }
  0x39   : > { %561 = dma.done.wait (%p654_p8), %s143_s3, 256  }
  0x3a   : > { %563 = vsyncadd (%p654_p8), %s143_s3, 4294967040  ;;  %v174_v0 = vlaneseq  ;;  %v595_v1 = vmov 1983009808   ;;  %v166_v6 = vld [vmem:[%s146_s4] sm:$0xff]  ;;  %v167_v7 = vld [vmem:[%s146_s4 + $0x8] sm:$0xff]  ;;  %vm212_vm0 = vcmask 1041408  }
  0x3b   : > { %v172_v2 = vunpack.c.l.s4 %v595_v1  ;;  %v170_v8 = vcombine.high %v166_v6, %v166_v6  ;;  %v187_v10 = vcombine.high %v167_v7, %v167_v7  ;;  %vm277_vm1 = vcmask 1041409   ;;  %s405_s18 = sshll.u32 %s719_s26, 3  ;;  %s407_s30 = sshll.u32 %s582_s9, 7 }
  0x3c   : > { %v175_v3 = vshrl.u32 %v174_v0, 7  ;;  %vm279_vm2 = vcmask 1042434   ;;  %vm281_vm3 = vcmask 1043459   ;;  %vm283_vm4 = vcmask 1044484   ;;  %s164_s27 = scalar_lea.vmem [#allocation5], %s405_s18  ;;  %s744_s12 = scalar_lea.hbm %s792_s1, %s407_s30 }
  0x3d   : > { %v173_v4 = vunpack.c.0.s8 %v172_v2  ;;  %vm285_vm5 = vcmask 1045509   ;;  %vm287_vm6 = vcmask 1046534   ;;  %s309_s29 = sshll.u32 %s164_s27, 4  ;;  %vm289_vm7 = vcmask 1047559   ;;  %s294_s13 = scalar_lea.sflag [#allocation4], %s719_s26  ;;  %s739_s29 = int_to_ptr.vmem [resolvable:$true] %s309_s29 }
  0x3e   : > { %s508_s15 = scalar_lea.vmem %s739_s29, 128  ;;  %p800_p9 = scmp.ne.s32.totalorder %s796_s19, 0 }
  0x3f   : > { %v176_v5 = vsub.s32 %v173_v4, %v175_v3  ;;  %p509_p8 = scmp.ne.s32.totalorder %s739_s29, %s508_s15  ;;  %s596_s9 = smov [#allocation5]  }
  0x40   : > { %s512_s16 = sshll.u32 %s596_s9, 4  ;;  %s513_s16 = int_to_ptr.vmem [resolvable:$false] %s512_s16 }
  0x41   : > { %v177_v9 = vrot.slane %v166_v6, %v176_v5  ;;  %v194_v11 = vrot.slane %v167_v7, %v176_v5  ;;  %v184_v12 = vrot.slane %v170_v8, %v176_v5  ;;  %v201_v14 = vrot.slane %v187_v10, %v176_v5  ;;  %p510_p11 = pnand %p509_p8, %p800_p9  ;;  %s514_s17 = scalar_lea.vmem %s513_s16, 256 }
  0x42   : > { %p515_p6 = scmp.lt.s32.totalorder %s739_s29, %s513_s16  ;;  %p516_p13 = scmp.lt.s32.totalorder %s514_s17, %s508_s15 }
  0x43   : > { %v185_v13 = vcombine.high %v177_v9, %v177_v9  ;;  %v202_v15 = vcombine.high %v194_v11, %v194_v11  ;;  %v213_v16 = vsel %vm212_vm0, %v177_v9, -inf  ;;  %v241_v17 = vsel %vm212_vm0, %v194_v11, -inf  ;;  %p511_p0 = pneg %p510_p11 }
  0x44   : > { %v186_v18 = vcombine.high %v184_v12, %v184_v12  ;;  %v203_v19 = vcombine.high %v201_v14, %v201_v14  ;;  %v214_v20 = vrot.slane %v213_v16, 4  ;;  %v227_v23 = vsel %vm212_vm0, %v184_v12, -inf  ;;  %p517_p2 = por %p516_p13, %p515_p6 }
  0x45   : > { %v220_v21 = vsel %vm212_vm0, %v185_v13, -inf  ;;  %v242_v24 = vrot.slane %v241_v17, 4  ;;  %v248_v25 = vsel %vm212_vm0, %v202_v15, -inf  ;;  %v228_v27 = vrot.slane %v227_v23, 4 }
  0x46   : > { %v221_v22 = vrot.slane %v220_v21, 4  ;;  %v215_v26 = vmax.f32 %v213_v16, %v214_v20  ;;  %v234_v28 = vsel %vm212_vm0, %v186_v18, -inf  ;;  %v249_v29 = vrot.slane %v248_v25, 4  ;;  %p518_p5 = pnand %p517_p2, %p511_p0 }
  0x47   : > { %v235_v31 = vrot.slane %v234_v28, 4  ;;  %v243_v32 = vmax.f32 %v241_v17, %v242_v24  ;;  %v255_v33 = vsel %vm212_vm0, %v201_v14, -inf  ;;  %v229_v35 = vmax.f32 %v227_v23, %v228_v27 }
  0x48   : > { %v222_v30 = vmax.f32 %v220_v21, %v221_v22  ;;  %v216_v34 = vrot.slane %v215_v26, 2  ;;  %v250_v36 = vmax.f32 %v248_v25, %v249_v29  ;;  %v256_v37 = vrot.slane %v255_v33, 4 }
  0x49   : > { %v236_v39 = vmax.f32 %v234_v28, %v235_v31  ;;  %v244_v40 = vrot.slane %v243_v32, 2  ;;  %v262_v41 = vsel %vm212_vm0, %v203_v19, -inf  ;;  %v230_v43 = vrot.slane %v229_v35, 2 }
  0x4a   : > { %v223_v38 = vrot.slane %v222_v30, 2  ;;  %v217_v42 = vmax.f32 %v215_v26, %v216_v34  ;;  %v251_v44 = vrot.slane %v250_v36, 2  ;;  %v257_v45 = vmax.f32 %v255_v33, %v256_v37 }
  0x4b   : > { %v237_v47 = vrot.slane %v236_v39, 2  ;;  %v245_v48 = vmax.f32 %v243_v32, %v244_v40  ;;  %v263_v49 = vrot.slane %v262_v41, 4  ;;  %v231_v51 = vmax.f32 %v229_v35, %v230_v43 }
  0x4c   : > { %v224_v46 = vmax.f32 %v222_v30, %v223_v38  ;;  %v218_v50 = vrot.slane %v217_v42, 1  ;;  %v252_v52 = vmax.f32 %v250_v36, %v251_v44  ;;  %v258_v53 = vrot.slane %v257_v45, 2 }
  0x4d   : > { %v238_v55 = vmax.f32 %v236_v39, %v237_v47  ;;  %v246_v56 = vrot.slane %v245_v48, 1  ;;  %v264_v57 = vmax.f32 %v262_v41, %v263_v49  ;;  %v232_v59 = vrot.slane %v231_v51, 1 }
  0x4e   : > { %v225_v54 = vrot.slane %v224_v46, 1  ;;  %v219_v58 = vmax.f32 %v217_v42, %v218_v50  ;;  %v253_v60 = vrot.slane %v252_v52, 1  ;;  %v259_v61 = vmax.f32 %v257_v45, %v258_v53 }
  0x4f   : > { %v239_v63 = vrot.slane %v238_v55, 1  ;;  %v265_v0 = vrot.slane %v264_v57, 2  ;;  %v233_v1 = vmax.f32 %v231_v51, %v232_v59  ;;  %v247_v2 = vmax.f32 %v245_v48, %v246_v56 }
  0x50   : > { %v226_v62 = vmax.f32 %v224_v46, %v225_v54  ;;  %v260_v3 = vrot.slane %v259_v61, 1  ;;  %v254_v5 = vmax.f32 %v252_v52, %v253_v60 }
  0x51   : > { %v240_v4 = vmax.f32 %v238_v55, %v239_v63  ;;  %v266_v6 = vmax.f32 %v264_v57, %v265_v0 }
  0x52   : > { %v278_v7 = vsel %vm277_vm1, %v226_v62, %v219_v58  ;;  %v261_v8 = vmax.f32 %v259_v61, %v260_v3 }
  0x53   : > { %v280_v9 = vsel %vm279_vm2, %v233_v1, %v278_v7  ;;  %v267_v10 = vrot.slane %v266_v6, 1 }
  0x54   : > { %v282_v11 = vsel %vm281_vm3, %v240_v4, %v280_v9 }
  0x55   : > { %v284_v12 = vsel %vm283_vm4, %v247_v2, %v282_v11  ;;  %v268_v13 = vmax.f32 %v266_v6, %v267_v10 }
  0x56   : > { %v286_v14 = vsel %vm285_vm5, %v254_v5, %v284_v12 }
  0x57   : > { %v288_v15 = vsel %vm287_vm6, %v261_v8, %v286_v14 }
  0x58   : > { %v290_v16 = vsel %vm289_vm7, %v268_v13, %v288_v15 }
  0x59   : > { %292 = vst [vmem:[%s164_s27] sm:$0xff] %v290_v16 }
  0x5a   : > { %521 = shalt.err (!%p518_p5)
}
  0x5b   : > { %s522_s22 = scalar_lea.hbm %s744_s12, 128  ;;  %s526_s25 = scalar_lea.hbm %s792_s1, 256 }
  0x5c   : > { %p523_p4 = scmp.ne.s32.totalorder %s744_s12, %s522_s22  ;;  %p527_p12 = scmp.lt.u32.totalorder %s744_s12, %s792_s1 }
  0x5d   : > { %p528_p1 = scmp.lt.u32.totalorder %s526_s25, %s522_s22  ;;  %p530_p8 = scmp.lt.u32.totalorder %s522_s22, %s744_s12 }
  0x5e   : > { %p524_p7 = pnand %p523_p4, %p800_p9 }
  0x5f   : > { %p529_p3 = por %p528_p1, %p527_p12 }
  0x60   : > { %p525_p10 = pneg %p524_p7 }
  0x61   : > { %p531_p11 = por %p530_p8, %p529_p3 }
  0x63   : > { %p532_p0 = pnand %p531_p11, %p525_p10 }
  0x65   : > { %535 = shalt.err (!%p532_p0)
}
  0x66   : > { %413 = dma.vmem_to_hbm [thread:$0]  (%p800_p9), %s739_s29, 128, %s744_s12, %s294_s13  }
  0x67 PF: > { %s321_s3 = sand.u32 1, %s570_s6   ;;  %p801_p6 = scmp.ne.s32.totalorder %s797_s21, 0 }
  0x68   : > { %p802_p13 = scmp.ge.s32.totalorder %s590_s11, 2  ;;  %s322_s4 = scalar_lea.sflag [#allocation4], %s321_s3 }
  0x6a   : > { %p420_p2 = pnand %p802_p13, %p801_p6 }
  0x6c   : > { %565 = dma.done.wait (!%p420_p2), %s322_s4, 128  }
  0x6d   : > { %567 = vsyncadd (!%p420_p2), %s322_s4, 4294967168  ;;  %s17_s11 = sadd.s32 1, %s590_s11   ;;  %s803_s6 = smov %s574_s7 }
  0x6e   : > { %p14_p5 = scmp.ge.s32.totalorder %s17_s11, 4   ;;  %s804_s7 = smov %s578_s8 }
  0x6f   : > { %s805_s8 = smov %s663_s20  ;;  %s806_s9 = smov %s586_s10 }
  0x70   : > { %s807_s10 = smov %s809_s14  ;;  %16 = sbr.rel (!%p14_p5) target bundleno = 6 (0x6), region = 69 }
  0x77   :  { %327 = vsyncpa [#allocation3], 1 }
  0x78   :  { %329 = vsyncpa [#allocation3 + $0x1], 1 }
  0x79   :  { %330 = vsyncpa [#allocation4], 1 }
  0x7a   :  { %332 = vsyncpa [#allocation4 + $0x1], 1 }

</bundles_post_ra>
